<compile_context>
chip_gen: v5e
topology: v5e:2x2
jax: 0.10.0
libtpu: 0.0.40
codegen_flags: <defaults>
</compile_context>

<pallas_src>
import functools

import jax
import jax.numpy as jnp
import numpy as np
from jax import lax
from jax.experimental import pallas as pl
from jax.experimental.pallas import tpu as pltpu


def _stack_time_kernel(lens_ref, x_ref, o_ref, *, factor, t_total):
    """One grid step: `tq` output timesteps for all batches / channels.

    lens_ref : (1, N, 1) int32   (same tiny block every step -> not re-DMA'd)
    x_ref    : (factor*tq, N, C) input tile
    o_ref    : (tq, N, factor*C) output tile
    """
    ftq, n, c = x_ref.shape
    tq = ftq // factor

    x = x_ref[...]                                          # (factor*tq, N, C)
    lens = jnp.minimum(lens_ref[...], t_total)              # (1, N, 1)

    # Global time index of every row in this tile; rows >= x_lens[b] (which
    # includes the clipped ragged-tail rows t >= T) are zeroed.
    t0 = pl.program_id(0) * ftq
    t_idx = t0 + lax.broadcasted_iota(jnp.int32, (ftq, n, 1), 0)
    xm = jnp.where(t_idx < lens, x, jnp.zeros_like(x))      # mask broadcasts over C

    # out[to, b, f*C + c] = xm[to*factor + f, b, c]
    xr = xm.reshape(tq, factor, n, c)                       # leading-dim split only
    for f in range(factor):                                 # static sliced stores
        o_ref[:, :, f * c:(f + 1) * c] = xr[:, f].astype(o_ref.dtype)


def stack_time(x, x_lens, factor, *, tq=None, target_block_bytes=2 << 20):
    """Pallas implementation of StackTime.forward_f32.

    x:      (T, N, C) float array
    x_lens: (N,) int array
    returns (T_out, N, C*factor) with T_out = (T + T % factor) // factor
    """
    T, N, C = x.shape
    pad = T % factor
    T_pad = T + pad
    # Same constraint the torch.reshape imposes in forward_f32.
    assert T_pad % factor == 0, "T + (T % factor) must be divisible by factor"
    T_out = T_pad // factor

    itemsize = jnp.dtype(x.dtype).itemsize
    if tq is None:
        # ~2 MiB input blocks; try to give the pipeline / v7x megacore at
        # least ~8 grid steps when the sequence allows it.
        in_row_bytes = factor * N * C * itemsize
        tq_cap = max(1, target_block_bytes // in_row_bytes)
        tq_split = max(1, pl.cdiv(T_out, 8))
        tq = int(max(1, min(tq_cap, tq_split, T_out)))
    tq = int(max(1, min(tq, T_out)))
    grid = (pl.cdiv(T_out, tq),)

    lens = x_lens.astype(jnp.int32).reshape(1, N, 1)

    # VMEM budget estimate for the double-buffered (padded) blocks.
    def _block_bytes(rows, sub, lane):
        return rows * (pl.cdiv(sub, 8) * 8) * (pl.cdiv(lane, 128) * 128) * itemsize

    live = 2 * (_block_bytes(factor * tq, N, C) + _block_bytes(tq, N, factor * C))
    vmem_limit = int(min(max(live + (2 << 20), 24 << 20), 48 << 20))

    kernel = functools.partial(_stack_time_kernel, factor=factor, t_total=T)

    return pl.pallas_call(
        kernel,
        out_shape=jax.ShapeDtypeStruct((T_out, N, factor * C), x.dtype),
        grid_spec=pl.GridSpec(
            grid=grid,
            in_specs=[
                pl.BlockSpec((1, N, 1), lambda i: (0, 0, 0)),            # x_lens
                pl.BlockSpec((factor * tq, N, C), lambda i: (i, 0, 0)),  # x tile
            ],
            out_specs=pl.BlockSpec((tq, N, factor * C), lambda i: (i, 0, 0)),
        ),
        compiler_params=pltpu.CompilerParams(
            dimension_semantics=("parallel",),
            vmem_limit_bytes=vmem_limit,
        ),
    )(lens, x)


def stack_time_ref(x, x_lens, factor):
    """Pure-JAX mirror of the PyTorch forward_f32 (for validation)."""
    T, N, C = x.shape
    t_idx = jnp.arange(T)[:, None, None]
    x = jnp.where(t_idx < x_lens.astype(jnp.int32)[None, :, None], x, 0)
    pad = T % factor
    x = jnp.transpose(x, (1, 0, 2))                          # (N, T, C)
    x = jnp.concatenate([x, jnp.zeros((N, pad, C), x.dtype)], axis=1)
    x = x.reshape(N, (T + pad) // factor, C * factor)
    return jnp.transpose(x, (1, 0, 2))                       # (T_out, N, C*factor)


if __name__ == "__main__":
    key = jax.random.PRNGKey(0)
    k1, k2 = jax.random.split(key)

    # Case 1: factor=2, odd T (ragged tail handled in-kernel), explicit tiling
    # that does NOT divide T_out (exercises clipped edge blocks on both sides).
    T, N, C, factor = 63, 4, 32, 2
    x = jax.random.normal(k1, (T, N, C), dtype=jnp.float32)
    x_lens = jnp.array([63, 40, 17, 1], dtype=jnp.int32)

    ref = jax.block_until_ready(stack_time_ref(x, x_lens, factor))

    out = jax.block_until_ready(stack_time(x, x_lens, factor, tq=7))  # grid=5
    assert out.shape == ref.shape == ((T + T % factor) // factor, N, C * factor)
    np.testing.assert_allclose(np.asarray(out), np.asarray(ref), rtol=0, atol=0)

    # Same inputs, default (auto) tiling -> ~8 grid steps.
    out2 = jax.block_until_ready(stack_time(x, x_lens, factor))
    np.testing.assert_allclose(np.asarray(out2), np.asarray(ref), rtol=0, atol=0)

    # Case 2: factor=4 with a 2-row ragged tail, odd batch, zero-length entry.
    T2, N2, C2, factor2 = 18, 5, 16, 4
    x2 = jax.random.normal(k2, (T2, N2, C2), dtype=jnp.float32)
    x2_lens = jnp.array([18, 11, 5, 1, 0], dtype=jnp.int32)
    out3 = jax.block_until_ready(stack_time(x2, x2_lens, factor2, tq=2))  # grid=3
    ref3 = jax.block_until_ready(stack_time_ref(x2, x2_lens, factor2))
    np.testing.assert_allclose(np.asarray(out3), np.asarray(ref3), rtol=0, atol=0)

    print("KERNEL_OK")
</pallas_src>

<mosaic_0001>
module attributes {stable_mosaic.version = 11 : i64} {
  func.func @_stack_time_kernel(%arg0: i32, %arg1: memref<1x4x1xi32, #tpu.memory_space<vmem>>, %arg2: memref<14x4x32xf32, #tpu.memory_space<vmem>>, %arg3: memref<7x4x64xf32, #tpu.memory_space<vmem>>) attributes {dimension_semantics = [#tpu.dimension_semantics<parallel>], iteration_bounds = array<i64: 5>, scalar_prefetch = 0 : i64, scratch_operands = 0 : i64, tpu.core_type = #tpu.core_type<tc>, window_params = [{pipeline_mode = #tpu.pipeline_mode<synchronous>, transform_indices = @transform_0, window_bounds = array<i64: 1, 4, 1>}, {transform_indices = @transform_1, window_bounds = array<i64: 14, 4, 32>}, {transform_indices = @transform_2, window_bounds = array<i64: 7, 4, 64>}]} {
    %c0 = arith.constant 0 : index
    %c0_0 = arith.constant 0 : index
    %c0_1 = arith.constant 0 : index
    %0 = vector.load %arg2[%c0, %c0_0, %c0_1] : memref<14x4x32xf32, #tpu.memory_space<vmem>>, vector<14x4x32xf32>
    %c0_2 = arith.constant 0 : index
    %c0_3 = arith.constant 0 : index
    %c0_4 = arith.constant 0 : index
    %1 = vector.load %arg1[%c0_2, %c0_3, %c0_4] : memref<1x4x1xi32, #tpu.memory_space<vmem>>, vector<1x4x1xi32>
    %c63_i32 = arith.constant 63 : i32
    %2 = vector.broadcast %c63_i32 : i32 to vector<1x4x1xi32>
    %3 = arith.minsi %1, %2 : vector<1x4x1xi32>
    %c14_i32 = arith.constant 14 : i32
    %4 = arith.muli %arg0, %c14_i32 : i32
    %5 = tpu.iota {dimensions = array<i32: 0>} : vector<14x4x1xi32>
    %6 = vector.broadcast %4 : i32 to vector<14x4x1xi32>
    %7 = arith.addi %6, %5 : vector<14x4x1xi32>
    %8 = vector.broadcast %3 : vector<1x4x1xi32> to vector<14x4x1xi32>
    %9 = arith.cmpi slt, %7, %8 : vector<14x4x1xi32>
    %cst = arith.constant 0.000000e+00 : f32
    %10 = vector.broadcast %cst : f32 to vector<14x4x32xf32>
    %11 = vector.shape_cast %9 : vector<14x4x1xi1> to vector<14x4x1xi1>
    %12 = vector.broadcast %11 : vector<14x4x1xi1> to vector<14x4x32xi1>
    %13 = arith.select %12, %0, %10 : vector<14x4x32xi1>, vector<14x4x32xf32>
    %14 = vector.shape_cast %13 : vector<14x4x32xf32> to vector<7x2x4x32xf32>
    %15 = vector.extract_strided_slice %14 {offsets = [0, 0, 0, 0], sizes = [7, 1, 4, 32], strides = [1, 1, 1, 1]} : vector<7x2x4x32xf32> to vector<7x1x4x32xf32>
    %16 = vector.shape_cast %15 : vector<7x1x4x32xf32> to vector<7x4x32xf32>
    %c0_5 = arith.constant 0 : index
    %c0_6 = arith.constant 0 : index
    %c0_7 = arith.constant 0 : index
    %17 = vector.load %arg3[%c0_5, %c0_6, %c0_7] : memref<7x4x64xf32, #tpu.memory_space<vmem>>, vector<7x4x32xf32>
    tpu.vector_store %arg3[%c0_5, %c0_6, %c0_7], %16 {strides = array<i32>} : memref<7x4x64xf32, #tpu.memory_space<vmem>>, vector<7x4x32xf32>,
    %18 = vector.extract_strided_slice %14 {offsets = [0, 1, 0, 0], sizes = [7, 1, 4, 32], strides = [1, 1, 1, 1]} : vector<7x2x4x32xf32> to vector<7x1x4x32xf32>
    %19 = vector.shape_cast %18 : vector<7x1x4x32xf32> to vector<7x4x32xf32>
    %c0_8 = arith.constant 0 : index
    %c0_9 = arith.constant 0 : index
    %c32 = arith.constant 32 : index
    %20 = vector.load %arg3[%c0_8, %c0_9, %c32] : memref<7x4x64xf32, #tpu.memory_space<vmem>>, vector<7x4x32xf32>
    tpu.vector_store %arg3[%c0_8, %c0_9, %c32], %19 {strides = array<i32>} : memref<7x4x64xf32, #tpu.memory_space<vmem>>, vector<7x4x32xf32>,
    return
  }
  func.func @transform_0(%arg0: i32) -> (i32, i32, i32) {
    %c0_i32 = arith.constant 0 : i32
    %c0_i32_0 = arith.constant 0 : i32
    %c0_i32_1 = arith.constant 0 : i32
    %c0_i32_2 = arith.constant 0 : i32
    return %c0_i32, %c0_i32_0, %c0_i32_1 : i32, i32, i32
  }
  func.func @transform_1(%arg0: i32) -> (i32, i32, i32) {
    %c0_i32 = arith.constant 0 : i32
    %c0_i32_0 = arith.constant 0 : i32
    %c0_i32_1 = arith.constant 0 : i32
    return %arg0, %c0_i32, %c0_i32_0 : i32, i32, i32
  }
  func.func @transform_2(%arg0: i32) -> (i32, i32, i32) {
    %c0_i32 = arith.constant 0 : i32
    %c0_i32_0 = arith.constant 0 : i32
    %c0_i32_1 = arith.constant 0 : i32
    return %arg0, %c0_i32, %c0_i32_0 : i32, i32, i32
  }
}

</mosaic_0001>

<bundles_post_ra>
// kernel: tpu_custom_call.1
= control target key start
LH: loop header
LB: loop body
LE: loop exit
PB: predicated region body
PF: predicated region fallthrough
CT: control target
= control target key end

     0   :  { %7 = vsyncpa [#allocation3], 0  ;;  %s754_s0 = inlined_call_operand.vmem [shape: s32[1,4,1], index: 0, kind: input, shape index: {}]   ;;  %s755_s1 = inlined_call_operand.vmem [shape: f32[63,4,32], index: 1, kind: input, shape index: {}]   ;;  %s756_s2 = inlined_call_operand.hbm [shape: f32[32,4,64], index: 2, kind: output, shape index: {}]  }
   0x1   :  { %9 = vsyncpa [#allocation3 + $0x1], 0  ;;  %s582_s9 = smov 0   ;;  %s584_s10 = smov 0  }
   0x2   :  { %s586_s11 = smov 0   ;;  %s588_s12 = smov 0  }
   0x3 LB: > { %s603_s13 = sadd.s32 4294967295, %s560_s12   ;;  %s428_s14 = sadd.s32 4294967294, %s560_s12   ;;  %s560_s12 = sphi %s588_s12, %s763_s12   ;;  %s556_s11 = sphi %s586_s11, %s762_s11   ;;  %s552_s10 = sphi %s584_s10, %s761_s10   ;;  %s548_s9 = sphi %s582_s9, %s760_s9  }
   0x4   : > { %s607_s15 = sadd.s32 1, %s560_s12   ;;  %s69_s16 = sadd.s32 1, %s556_s11 }
   0x5   : > { %s66_s17 = ssub.s32 %s560_s12, %s607_s15  ;;  %p79_p0 = scmp.ne.s32.totalorder %s556_s11, %s552_s10 }
   0x6   : > { %p67_p1 = scmp.eq.s32.totalorder %s66_s17, 0  ;;  %p80_p2 = scmp.eq.s32.totalorder %s603_s13, 4 }
   0x7   : > { %p85_p3 = scmp.ne.s32.totalorder %s552_s10, %s548_s9  ;;  %p86_p4 = scmp.eq.s32.totalorder %s428_s14, 4 }
   0x8   : > { %s618_s18 = scalar_select %p67_p1, %s556_s11, %s69_s16  }
   0x9   : > { %p620_p5 = por %p80_p2, %p79_p0  ;;  %p624_p6 = por %p86_p4, %p85_p3 }
   0xa   : > { %p431_p7 = scmp.ge.s32.totalorder %s560_s12, 1  ;;  %p124_p8 = scmp.lt.s32.totalorder %s560_s12, 6 }
   0xc   : > { %p125_p9 = pnand %p431_p7, %p124_p8 }
   0xd   : > { %s631_s21 = smul.u32 (!%p125_p9), 14, %s603_s13  ;;  %s147_s24 = sand.u32 (!%p125_p9), 1, %s552_s10  }
   0xe   : > { %128 = sbr.rel (%p125_p9) target bundleno = 305 (0x131), region = 28  ;;  %s563_s3 = smov (!%p125_p9), 32  }
   0xf   : > { %p155_p10 = scmp.lt.s32.totalorder (!%p125_p9), %s631_s21, 62  ;;  %s441_s26 = smul.u32 (!%p125_p9), 28, %s147_s24 }
  0x10   : > { %s693_s4 = scalar_lea.sflag (!%p125_p9), [#allocation3], %s147_s24 }
  0x11   : > { %s648_s30 = scalar_lea.vmem (!%p125_p9), [#allocation2], %s441_s26 }
  0x13   : > { %v183_v0 = vld [vmem:[%s754_s0] sm:$0xf]  ;;  %v562_v1 = vmov 0   ;;  %v187_v3 = vstv %s631_s21  ;;  %s765_s21 = smov (!%p155_p10, %s631_s21), 62  ;;  %vm299_vm15 = vcmask 257024   ;;  %s351_s5 = smul.u32 (%p620_p5), 7, %s603_s13 }
  0x14   : > { %484 = vset.pattern.permute.xlu0 %v562_v1  ;;  %vm184_vm0 = vcmp.lt.s32.totalorder %v183_v0, 63  ;;  %486 = vset.pattern.permute.xlu2 %v562_v1  ;;  %v191_v4 = vadd.s32 4, %v187_v3  ;;  %v189_v5 = vadd.s32 2, %v187_v3  ;;  %v188_v6 = vadd.s32 1, %v187_v3  ;;  %s432_s25 = sshll.u32 %s765_s21, 2 }
  0x15   : > { %v185_v2 = vsel %vm184_vm0, %v183_v0, 63  ;;  %485 = vset.pattern.permute.xlu1 %v562_v1  ;;  %v192_v8 = vadd.s32 5, %v187_v3  ;;  %v190_v9 = vadd.s32 3, %v187_v3  ;;  %v194_v13 = vadd.s32 7, %v187_v3  ;;  %s645_s29 = scalar_lea.vmem %s755_s1, %s432_s25  ;;  %s352_s6 = ssub.s32 (%p620_p5), 32, %s351_s5 }
  0x16   : > { %vm201_vm1 = vcmp.lt.s32.totalorder %v187_v3, %v185_v2  ;;  %vm205_vm2 = vcmp.lt.s32.totalorder %v191_v4, %v185_v2  ;;  %vm203_vm3 = vcmp.lt.s32.totalorder %v189_v5, %v185_v2  ;;  %vm202_vm4 = vcmp.lt.s32.totalorder %v188_v6, %v185_v2  ;;  %v173_v31 = vld [vmem:[%s645_s29 + $0x10] sm:$0xf]  ;;  %v174_v34 = vld [vmem:[%s645_s29 + $0x14] sm:$0xf]  ;;  %v180_v37 = vld [vmem:[%s645_s29 + $0x2c] sm:$0xf] }
  0x17   : > { %v215_v7 = vsel %vm201_vm1, 1, %v562_v1  ;;  %v219_v10 = vsel %vm205_vm2, 1, %v562_v1  ;;  %v217_v11 = vsel %vm203_vm3, 1, %v562_v1  ;;  %vm206_vm5 = vcmp.lt.s32.totalorder %v192_v8, %v185_v2  ;;  %v169_v40 = vld [vmem:[%s645_s29] sm:$0xf]  ;;  %p353_p11 = scmp.lt.s32.totalorder (%p620_p5), %s352_s6, 7 }
  0x18   : > { %230 = vperm.xlu0 %484, %v215_v7   ;;  %242 = vperm.xlu2 %486, %v219_v10   ;;  %vm204_vm6 = vcmp.lt.s32.totalorder %v190_v9, %v185_v2  ;;  %v216_v12 = vsel %vm202_vm4, 1, %v562_v1  ;;  %v220_v14 = vsel %vm206_vm5, 1, %v562_v1  ;;  %v198_v16 = vadd.s32 11, %v187_v3  ;;  %v177_v42 = vld [vmem:[%s645_s29 + $0x20] sm:$0xf] }
  0x19   : > { %236 = vperm.xlu1 %485, %v217_v11   ;;  %v218_v15 = vsel %vm204_vm6, 1, %v562_v1  ;;  %v196_v17 = vadd.s32 9, %v187_v3  ;;  %vm208_vm7 = vcmp.lt.s32.totalorder %v194_v13, %v185_v2  ;;  %v200_v19 = vadd.s32 13, %v187_v3  ;;  %v171_v43 = vld [vmem:[%s645_s29 + $0x8] sm:$0xf] }
  0x1a   : > { %vm212_vm8 = vcmp.lt.s32.totalorder %v198_v16, %v185_v2  ;;  %v222_v18 = vsel %vm208_vm7, 1, %v562_v1  ;;  %v195_v22 = vadd.s32 8, %v187_v3  ;;  %v193_v23 = vadd.s32 6, %v187_v3  ;;  %v170_v49 = vld [vmem:[%s645_s29 + $0x4] sm:$0xf] }
  0x1b   : > { %vm210_vm9 = vcmp.lt.s32.totalorder %v196_v17, %v185_v2  ;;  %v226_v20 = vsel %vm212_vm8, 1, %v562_v1  ;;  %vm214_vm10 = vcmp.lt.s32.totalorder %v200_v19, %v185_v2  ;;  %v197_v25 = vadd.s32 10, %v187_v3  ;;  %v172_v51 = vld [vmem:[%s645_s29 + $0xc] sm:$0xf]  ;;  %v176_v55 = vld [vmem:[%s645_s29 + $0x1c] sm:$0xf] }
  0x1c   : > { %v224_v21 = vsel %vm210_vm9, 1, %v562_v1  ;;  %vm209_vm11 = vcmp.lt.s32.totalorder %v195_v22, %v185_v2  ;;  %vm207_vm12 = vcmp.lt.s32.totalorder %v193_v23, %v185_v2  ;;  %v228_v24 = vsel %vm214_vm10, 1, %v562_v1  ;;  %v178_v57 = vld [vmem:[%s645_s29 + $0x24] sm:$0xf]  ;;  %v182_v61 = vld [vmem:[%s645_s29 + $0x34] sm:$0xf] }
  0x1d   : > { %v223_v26 = vsel %vm209_vm11, 1, %v562_v1  ;;  %v221_v27 = vsel %vm207_vm12, 1, %v562_v1  ;;  %v199_v28 = vadd.s32 12, %v187_v3  ;;  %vm211_vm13 = vcmp.lt.s32.totalorder %v197_v25, %v185_v2  ;;  %v175_v63 = vld [vmem:[%s645_s29 + $0x18] sm:$0xf] }
  0x1e   : > { %v225_v29 = vsel %vm211_vm13, 1, %v562_v1  ;;  %v179_v3 = vld [vmem:[%s645_s29 + $0x28] sm:$0xf]  ;;  %v181_v5 = vld [vmem:[%s645_s29 + $0x30] sm:$0xf] }
  0x1f   : > { %vm213_vm14 = vcmp.lt.s32.totalorder %v199_v28, %v185_v2 }
  0x20   : > { %233 = vperm.xlu0 %484, %v216_v12   ;;  %245 = vperm.xlu2 %486, %v220_v14   ;;  %v227_v30 = vsel %vm213_vm14, 1, %v562_v1  ;;  %vm335_vm14 = vcmask 519424  }
  0x21   : > { %239 = vperm.xlu1 %485, %v218_v15  }
  0x28   : > { %251 = vperm.xlu0 %484, %v222_v18   ;;  %263 = vperm.xlu2 %486, %v226_v20  }
  0x29   : > { %257 = vperm.xlu1 %485, %v224_v21  }
  0x30   : > { %269 = vperm.xlu0 %484, %v228_v24   ;;  %254 = vperm.xlu2 %486, %v223_v26  }
  0x31   : > { %248 = vperm.xlu1 %485, %v221_v27  }
  0x38   : > { %260 = vperm.xlu0 %484, %v225_v29  }
  0x39   : > { %266 = vperm.xlu1 %485, %v227_v30  }
  0x72   : > { %v243_v32 = vpop.permute.xlu2 %242 }
  0x73   : > { %vm275_vm0 = vcmp.eq.s32.totalorder %v243_v32, 1 }
  0x74   : > { %v289_v33 = vsel %vm275_vm0, %v173_v31, 0.0 }
  0x75   : > { %302 = vst.msk [vmem:[%s648_s30 + $0x8] sm:$0xf] %vm299_vm15, %v289_v33 }
  0x7a   : > { %v246_v35 = vpop.permute.xlu2 %245 }
  0x7b   : > { %vm276_vm1 = vcmp.eq.s32.totalorder %v246_v35, 1 }
  0x7c   : > { %v290_v36 = vsel %vm276_vm1, %v174_v34, 0.0 }
  0x7d   : > { %318 = vrot.lane.b32.xlu1 %v290_v36, %s563_s3 }
  0x82   : > { %v264_v38 = vpop.permute.xlu2 %263 }
  0x83   : > { %vm282_vm2 = vcmp.eq.s32.totalorder %v264_v38, 1 }
  0x84   : > { %v296_v39 = vsel %vm282_vm2, %v180_v37, 0.0 }
  0x85   : > { %324 = vrot.lane.b32.xlu1 %v296_v39, %s563_s3 }
  0x8a   : > { %v231_v41 = vpop.permute.xlu0 %230  ;;  %v255_v45 = vpop.permute.xlu2 %254 }
  0x8b   : > { %vm271_vm3 = vcmp.eq.s32.totalorder %v231_v41, 1  ;;  %v237_v46 = vpop.permute.xlu1 %236  ;;  %vm279_vm4 = vcmp.eq.s32.totalorder %v255_v45, 1 }
  0x8c   : > { %v285_v44 = vsel %vm271_vm3, %v169_v40, 0.0  ;;  %vm273_vm5 = vcmp.eq.s32.totalorder %v237_v46, 1  ;;  %v293_v47 = vsel %vm279_vm4, %v177_v42, 0.0 }
  0x8d   : > { %300 = vst.msk [vmem:[%s648_s30] sm:$0xf] %vm299_vm15, %v285_v44  ;;  %v287_v48 = vsel %vm273_vm5, %v171_v43, 0.0 }
  0x8e   : > { %304 = vst.msk [vmem:[%s648_s30 + $0x10] sm:$0xf] %vm299_vm15, %v293_v47 }
  0x8f   : > { %301 = vst.msk [vmem:[%s648_s30 + $0x4] sm:$0xf] %vm299_vm15, %v287_v48 }
  0x92   : > { %v234_v50 = vpop.permute.xlu0 %233 }
  0x93   : > { %vm272_vm6 = vcmp.eq.s32.totalorder %v234_v50, 1  ;;  %v240_v53 = vpop.permute.xlu1 %239 }
  0x94   : > { %v286_v52 = vsel %vm272_vm6, %v170_v49, 0.0  ;;  %vm274_vm7 = vcmp.eq.s32.totalorder %v240_v53, 1 }
  0x95   : > { %314 = vrot.lane.b32.xlu2 %v286_v52, %s563_s3  ;;  %v288_v54 = vsel %vm274_vm7, %v172_v51, 0.0 }
  0x96   : > { %316 = vrot.lane.b32.xlu0 %v288_v54, %s563_s3 }
  0x9a   : > { %v252_v56 = vpop.permute.xlu0 %251 }
  0x9b   : > { %vm278_vm8 = vcmp.eq.s32.totalorder %v252_v56, 1  ;;  %v258_v59 = vpop.permute.xlu1 %257 }
  0x9c   : > { %v292_v58 = vsel %vm278_vm8, %v176_v55, 0.0  ;;  %vm280_vm9 = vcmp.eq.s32.totalorder %v258_v59, 1 }
  0x9d   : > { %320 = vrot.lane.b32.xlu2 %v292_v58, %s563_s3  ;;  %v294_v60 = vsel %vm280_vm9, %v178_v57, 0.0 }
  0x9e   : > { %322 = vrot.lane.b32.xlu0 %v294_v60, %s563_s3 }
  0xa2   : > { %v270_v62 = vpop.permute.xlu0 %269 }
  0xa3   : > { %vm284_vm10 = vcmp.eq.s32.totalorder %v270_v62, 1  ;;  %v249_v1 = vpop.permute.xlu1 %248 }
  0xa4   : > { %v298_v0 = vsel %vm284_vm10, %v182_v61, 0.0  ;;  %vm277_vm11 = vcmp.eq.s32.totalorder %v249_v1, 1 }
  0xa5   : > { %326 = vrot.lane.b32.xlu2 %v298_v0, %s563_s3  ;;  %v291_v2 = vsel %vm277_vm11, %v175_v63, 0.0 }
  0xa6   : > { %303 = vst.msk [vmem:[%s648_s30 + $0xc] sm:$0xf] %vm299_vm15, %v291_v2 }
  0xaa   : > { %v261_v4 = vpop.permute.xlu0 %260 }
  0xab   : > { %vm281_vm12 = vcmp.eq.s32.totalorder %v261_v4, 1  ;;  %v267_v7 = vpop.permute.xlu1 %266 }
  0xac   : > { %v295_v6 = vsel %vm281_vm12, %v179_v3, 0.0  ;;  %vm283_vm13 = vcmp.eq.s32.totalorder %v267_v7, 1 }
  0xad   : > { %305 = vst.msk [vmem:[%s648_s30 + $0x14] sm:$0xf] %vm299_vm15, %v295_v6  ;;  %v297_v8 = vsel %vm283_vm13, %v181_v5, 0.0 }
  0xae   : > { %306 = vst.msk [vmem:[%s648_s30 + $0x18] sm:$0xf] %vm299_vm15, %v297_v8 }
  0xef   : > { %v315_v9 = vpop.permute.xlu2 %314  ;;  %v319_v10 = vpop.permute.xlu1 %318 }
  0xf0   : > { %336 = vst.msk [vmem:[%s648_s30] sm:$0xf] %vm335_vm14, %v315_v9 }
  0xf1   : > { %338 = vst.msk [vmem:[%s648_s30 + $0x8] sm:$0xf] %vm335_vm14, %v319_v10 }
  0xf7   : > { %v321_v11 = vpop.permute.xlu2 %320  ;;  %v325_v12 = vpop.permute.xlu1 %324 }
  0xf8   : > { %339 = vst.msk [vmem:[%s648_s30 + $0xc] sm:$0xf] %vm335_vm14, %v321_v11 }
  0xf9   : > { %341 = vst.msk [vmem:[%s648_s30 + $0x14] sm:$0xf] %vm335_vm14, %v325_v12 }
  0xff   : > { %v327_v13 = vpop.permute.xlu2 %326 }
 0x100   : > { %342 = vst.msk [vmem:[%s648_s30 + $0x18] sm:$0xf] %vm335_vm14, %v327_v13 }
 0x108   : > { %v317_v14 = vpop.permute.xlu0 %316 }
 0x109   : > { %337 = vst.msk [vmem:[%s648_s30 + $0x4] sm:$0xf] %vm335_vm14, %v317_v14 }
 0x10d   : > { %350 = sbr.rel (!%p620_p5) target bundleno = 305 (0x131), region = 32 }
 0x110   : > { %v323_v15 = vpop.permute.xlu0 %322 }
 0x111   : > { %340 = vst.msk [vmem:[%s648_s30 + $0x10] sm:$0xf] %vm335_vm14, %v323_v15 }
 0x112   : > { %s767_s6 = smov (!%p353_p11, %s352_s6), 7 }
 0x113   : > { %s433_s7 = sshll.u32 %s767_s6, 2 }
 0x114   : > { %s356_s8 = ssub.s32 28, %s433_s7 }
 0x115   : > { %s357_s14 = sshll.u32 %s356_s8, 4 }
 0x116   : > { %358 = vsyncadd %s693_s4, %s357_s14  ;;  %p702_p12 = scmp.ne.s32.totalorder %s433_s7, 0  ;;  %s440_s17 = smul.u32 28, %s603_s13 }
 0x117   : > { %s363_s19 = sshll.u32 %s648_s30, 4  ;;  %s437_s21 = sshll.u32 %s767_s6, 6  ;;  %s712_s19 = int_to_ptr.vmem [resolvable:$true] %s363_s19 }
 0x118   : > { %s361_s24 = scalar_lea.hbm %s756_s2, %s440_s17  ;;  %s487_s26 = sshra.s32 %s712_s19, 4  ;;  %s488_s26 = int_to_ptr.vmem [resolvable:$true] %s487_s26 }
 0x119   : > { %s365_s25 = sshll.u32 %s361_s24, 4  ;;  %s489_s27 = sshrl.u32 %s437_s21, 4  ;;  %s714_s25 = int_to_ptr.hbm [resolvable:$true] %s365_s25 }
 0x11a   : > { %s494_s28 = scalar_lea.vmem %s488_s26, %s489_s27  ;;  %s564_s13 = smov [#allocation2]  }
 0x11b   : > { %p495_p13 = scmp.ne.s32.totalorder %s488_s26, %s494_s28  ;;  %s498_s29 = scalar_lea.vmem %s564_s13, 56 }
 0x11c   : > { %p500_p2 = scmp.lt.s32.totalorder %s498_s29, %s494_s28 }
 0x11d   : > { %p496_p0 = pnand %p495_p13, %p702_p12 }
 0x11f   : > { %p497_p1 = pneg %p496_p0 }
 0x121   : > { %p502_p3 = pnand %p500_p2, %p497_p1 }
 0x123   : > { %505 = shalt.err (!%p502_p3)
}
 0x124   : > { %s506_s30 = sshra.s32 %s714_s25, 4  ;;  %s517_s8 = scalar_lea.hbm %s756_s2, 128  ;;  %s507_s30 = int_to_ptr.hbm [resolvable:$true] %s506_s30 }
 0x125   : > { %s513_s3 = scalar_lea.hbm %s507_s30, %s489_s27  ;;  %p518_p8 = scmp.lt.s32.totalorder %s507_s30, %s756_s2 }
 0x126   : > { %p514_p4 = scmp.ne.s32.totalorder %s507_s30, %s513_s3  ;;  %p519_p9 = scmp.lt.s32.totalorder %s517_s8, %s513_s3 }
 0x128   : > { %p515_p5 = pnand %p514_p4, %p702_p12  ;;  %p520_p10 = por %p519_p9, %p518_p8 }
 0x12a   : > { %p516_p7 = pneg %p515_p5 }
 0x12c   : > { %p521_p11 = pnand %p520_p10, %p516_p7 }
 0x12e   : > { %524 = shalt.err (!%p521_p11)
}
 0x12f   : > { %s565_s22 = smov 64   ;;  %s566_s23 = smov 4  }
 0x130   : > { %371 = dma.vmem_to_hbm [thread:$0]  (%p702_p12), %s712_s19, %s437_s21, %s714_s25, %s693_s4, %s565_s22, %s565_s22, %s566_s23  }
 0x131 PF: > { %p447_p13 = scmp.ge.s32.totalorder %s560_s12, 2  ;;  %s380_s24 = sand.u32 1, %s548_s9  }
 0x132   : > { %s381_s26 = scalar_lea.sflag [#allocation3], %s380_s24 }
 0x133   : > { %p444_p0 = pnand %p447_p13, %p624_p6 }
 0x135   : > { %p445_p1 = pneg %p444_p0 }
 0x137   : > { %543 = dma.done.wait (%p445_p1), %s381_s26, 448  }
 0x138   : > { %545 = vsyncadd (%p445_p1), %s381_s26, 4294966848  ;;  %p12_p2 = scmp.ge.s32.totalorder %s607_s15, 7   ;;  %s760_s9 = smov %s552_s10 }
 0x139   : > { %s761_s10 = smov %s556_s11  ;;  %s762_s11 = smov %s618_s18 }
 0x13a   : > { %s763_s12 = smov %s607_s15  ;;  %14 = sbr.rel (!%p12_p2) target bundleno = 3 (0x3), region = 63 }
 0x13f   :  { %387 = vsyncpa [#allocation3], 1 }
 0x140   :  { %389 = vsyncpa [#allocation3 + $0x1], 1 }

</bundles_post_ra>
